<compile_context>
chip_gen: v7x
topology: tpu7x:2x2x1
jax: 0.10.0
libtpu: 0.0.40
codegen_flags: <defaults>
</compile_context>

<pallas_src>
import functools

import jax
import jax.numpy as jnp
from jax.experimental import pallas as pl
from jax.experimental.pallas import tpu as pltpu

EPS = 1e-5


def _convblock_kernel(x_ref, w1_ref, b1_ref, w2_ref, b2_ref, ws_ref, bs_ref,
                      o_ref, *, batch_block):
    """Processes `batch_block` examples in NCL layout (L on the lane axis).

    x_ref  : (B, C_in, L)      bf16
    w1_ref : (C_out, 3*C_in)   bf16  BN1 scale pre-folded, tap-major columns
    w2_ref : (C_out, 3*C_out)  bf16  BN2 scale pre-folded
    ws_ref : (C_out, C_in)     bf16  BNs scale pre-folded (1x1 shortcut)
    b*_ref : (C_out, 1)        f32   folded conv-bias + BN bias
    o_ref  : (B, C_out, L)     f32
    """
    L = x_ref.shape[-1]
    bf16 = jnp.bfloat16
    f32 = jnp.float32

    # 0/1 shift matrices (built once per grid step):
    #   (x @ s_prev)[:, l] = x[:, l-1]  (zero at l = 0)
    #   (x @ s_next)[:, l] = x[:, l+1]  (zero at l = L-1)
    row = jax.lax.broadcasted_iota(jnp.int32, (L, L), 0)
    col = jax.lax.broadcasted_iota(jnp.int32, (L, L), 1)
    s_prev = jnp.where(col == row + 1, 1.0, 0.0).astype(bf16)
    s_next = jnp.where(row == col + 1, 1.0, 0.0).astype(bf16)

    # Hoist the (constant across the batch loop) weight / bias loads.
    w1 = w1_ref[...]
    w2 = w2_ref[...]
    ws = ws_ref[...]
    b1 = b1_ref[...]
    b2 = b2_ref[...]
    bs = bs_ref[...]

    for b in range(batch_block):                       # small static unroll
        x = x_ref[b]                                   # (C_in, L) bf16

        # ---- conv1: im2col over the 3 taps -> single MXU matmul ----
        x_prev = jnp.dot(x, s_prev, preferred_element_type=f32).astype(bf16)
        x_next = jnp.dot(x, s_next, preferred_element_type=f32).astype(bf16)
        taps1 = jnp.concatenate([x_prev, x, x_next], axis=0)     # (3*C_in, L)
        y1 = jnp.dot(w1, taps1, preferred_element_type=f32)      # (C_out, L)
        y1 = jnp.maximum(y1 + b1, 0.0).astype(bf16)

        # ---- conv2 ----
        y1_prev = jnp.dot(y1, s_prev, preferred_element_type=f32).astype(bf16)
        y1_next = jnp.dot(y1, s_next, preferred_element_type=f32).astype(bf16)
        taps2 = jnp.concatenate([y1_prev, y1, y1_next], axis=0)  # (3*C_out, L)
        y2 = jnp.dot(w2, taps2, preferred_element_type=f32)
        y2 = jnp.maximum(y2 + b2, 0.0)

        # ---- 1x1 shortcut conv ----
        sc = jnp.dot(ws, x, preferred_element_type=f32)
        sc = jnp.maximum(sc + bs, 0.0)

        o_ref[b] = (y2 + sc).astype(o_ref.dtype)


def conv_block_forward(x_ncl, params, *, batch_block=2):
    """x_ncl: (N, C_in, L) float -> (N, C_out, L) float32 (NCL end to end)."""
    w1, b1, w2, b2, ws, bs = params
    N, C_in, L = x_ncl.shape
    C_out = w1.shape[0]
    assert N % batch_block == 0, "batch must be divisible by batch_block"
    assert L % 128 == 0, "keep L a multiple of 128 so the lane axis is dense"

    x_bf16 = x_ncl.astype(jnp.bfloat16)
    kernel = functools.partial(_convblock_kernel, batch_block=batch_block)

    return pl.pallas_call(
        kernel,
        out_shape=jax.ShapeDtypeStruct((N, C_out, L), jnp.float32),
        grid_spec=pltpu.PrefetchScalarGridSpec(
            num_scalar_prefetch=0,
            grid=(N // batch_block,),
            in_specs=[
                pl.BlockSpec((batch_block, C_in, L), lambda i: (i, 0, 0)),
                pl.BlockSpec((C_out, 3 * C_in), lambda i: (0, 0)),
                pl.BlockSpec((C_out, 1), lambda i: (0, 0)),
                pl.BlockSpec((C_out, 3 * C_out), lambda i: (0, 0)),
                pl.BlockSpec((C_out, 1), lambda i: (0, 0)),
                pl.BlockSpec((C_out, C_in), lambda i: (0, 0)),
                pl.BlockSpec((C_out, 1), lambda i: (0, 0)),
            ],
            out_specs=pl.BlockSpec((batch_block, C_out, L),
                                   lambda i: (i, 0, 0)),
        ),
        compiler_params=pltpu.CompilerParams(
            dimension_semantics=("parallel",)),
    )(x_bf16, w1, b1, w2, b2, ws, bs)


# ------------------------- parameter preparation -------------------------

def _fold_bn_into_conv(w, conv_bias, gamma, beta, mean, var):
    """Fold BN (running stats) into conv weight & bias.  w: (C_out, C_in, K)."""
    scale = gamma / jnp.sqrt(var + EPS)                       # (C_out,)
    w_f = w * scale[:, None, None]
    bias = (conv_bias - mean) * scale + beta                  # keep this order
    return w_f, bias[:, None].astype(jnp.float32)             # (C_out, 1)


def _to_matmul_weight(w):
    """(C_out, C_in, K) PyTorch layout -> (C_out, K*C_in) bf16, tap-major."""
    c_out, c_in, k = w.shape
    return jnp.transpose(w, (0, 2, 1)).reshape(c_out, k * c_in).astype(jnp.bfloat16)


def init_params(key, in_channels, out_channels, kernel_size):
    assert kernel_size == 3, "VDCNN ConvBlock uses kernel_size=3 with padding=1"
    ks = jax.random.split(key, 9)
    w1 = 0.1 * jax.random.normal(ks[0], (out_channels, in_channels, kernel_size), jnp.float32)
    b1 = 0.1 * jax.random.normal(ks[1], (out_channels,), jnp.float32)
    w2 = 0.1 * jax.random.normal(ks[2], (out_channels, out_channels, kernel_size), jnp.float32)
    b2 = 0.1 * jax.random.normal(ks[3], (out_channels,), jnp.float32)
    ws = 0.1 * jax.random.normal(ks[4], (out_channels, in_channels, 1), jnp.float32)
    bs = 0.1 * jax.random.normal(ks[5], (out_channels,), jnp.float32)

    def bn(k):
        kk = jax.random.split(k, 4)
        gamma = 1.0 + 0.1 * jax.random.normal(kk[0], (out_channels,), jnp.float32)
        beta = 0.1 * jax.random.normal(kk[1], (out_channels,), jnp.float32)
        mean = 0.1 * jax.random.normal(kk[2], (out_channels,), jnp.float32)
        var = jnp.abs(1.0 + 0.1 * jax.random.normal(kk[3], (out_channels,), jnp.float32))
        return gamma, beta, mean, var

    w1f, b1f = _fold_bn_into_conv(w1, b1, *bn(ks[6]))
    w2f, b2f = _fold_bn_into_conv(w2, b2, *bn(ks[7]))
    wsf, bsf = _fold_bn_into_conv(ws, bs, *bn(ks[8]))

    return (_to_matmul_weight(w1f), b1f,
            _to_matmul_weight(w2f), b2f,
            wsf[:, :, 0].astype(jnp.bfloat16), bsf)


# ------------------------------ reference ------------------------------

def ref_forward(x_ncl, params):
    """Pure-JAX reference using the same bf16-rounded weights/activations."""
    w1, b1, w2, b2, ws, bs = params
    hi = jax.lax.Precision.HIGHEST
    x = x_ncl.astype(jnp.bfloat16).astype(jnp.float32)

    def conv3(xf, wmat):
        n, c, l = xf.shape
        xp = jnp.pad(xf, ((0, 0), (0, 0), (1, 1)))
        taps = jnp.concatenate([xp[:, :, k:k + l] for k in range(3)], axis=1)
        return jnp.einsum('ok,nkl->nol', wmat.astype(jnp.float32), taps,
                          precision=hi)

    y1 = jnp.maximum(conv3(x, w1) + b1[None], 0.0)
    y1 = y1.astype(jnp.bfloat16).astype(jnp.float32)   # kernel rounds y1 to bf16
    y2 = jnp.maximum(conv3(y1, w2) + b2[None], 0.0)
    sc = jnp.einsum('oc,ncl->nol', ws.astype(jnp.float32), x, precision=hi)
    sc = jnp.maximum(sc + bs[None], 0.0)
    return y2 + sc


if __name__ == "__main__":
    in_channels, out_channels, kernel_size = 16, 32, 3
    N, L = 4, 128

    key = jax.random.PRNGKey(0)
    kx, kp = jax.random.split(key)
    x = jax.random.normal(kx, (N, in_channels, L), jnp.float32)   # NCL (PyTorch)
    params = init_params(kp, in_channels, out_channels, kernel_size)

    out = conv_block_forward(x, params, batch_block=2)
    out = jax.block_until_ready(out)

    ref = ref_forward(x, params)
    assert out.shape == (N, out_channels, L)
    max_err = jnp.max(jnp.abs(out - ref))
    assert jnp.allclose(out, ref, atol=1e-2, rtol=1e-2), f"mismatch vs reference: {max_err}"

    print("KERNEL_OK")
</pallas_src>

<mosaic_0001>
module attributes {stable_mosaic.version = 11 : i64} {
  func.func @_convblock_kernel(%arg0: i32, %arg1: memref<2x16x128xbf16, #tpu.memory_space<vmem>>, %arg2: memref<32x48xbf16, #tpu.memory_space<vmem>>, %arg3: memref<32x1xf32, #tpu.memory_space<vmem>>, %arg4: memref<32x96xbf16, #tpu.memory_space<vmem>>, %arg5: memref<32x1xf32, #tpu.memory_space<vmem>>, %arg6: memref<32x16xbf16, #tpu.memory_space<vmem>>, %arg7: memref<32x1xf32, #tpu.memory_space<vmem>>, %arg8: memref<2x32x128xf32, #tpu.memory_space<vmem>>) attributes {dimension_semantics = [#tpu.dimension_semantics<parallel>], iteration_bounds = array<i64: 2>, scalar_prefetch = 0 : i64, scratch_operands = 0 : i64, tpu.core_type = #tpu.core_type<tc>, window_params = [{transform_indices = @transform_0, window_bounds = array<i64: 2, 16, 128>}, {pipeline_mode = #tpu.pipeline_mode<synchronous>, transform_indices = @transform_1, window_bounds = array<i64: 32, 48>}, {pipeline_mode = #tpu.pipeline_mode<synchronous>, transform_indices = @transform_2, window_bounds = array<i64: 32, 1>}, {pipeline_mode = #tpu.pipeline_mode<synchronous>, transform_indices = @transform_3, window_bounds = array<i64: 32, 96>}, {pipeline_mode = #tpu.pipeline_mode<synchronous>, transform_indices = @transform_4, window_bounds = array<i64: 32, 1>}, {pipeline_mode = #tpu.pipeline_mode<synchronous>, transform_indices = @transform_5, window_bounds = array<i64: 32, 16>}, {pipeline_mode = #tpu.pipeline_mode<synchronous>, transform_indices = @transform_6, window_bounds = array<i64: 32, 1>}, {transform_indices = @transform_7, window_bounds = array<i64: 2, 32, 128>}]} {
    %0 = tpu.iota {dimensions = array<i32: 0>} : vector<128x128xi32>
    %1 = tpu.iota {dimensions = array<i32: 1>} : vector<128x128xi32>
    %c1_i32 = arith.constant 1 : i32
    %2 = vector.broadcast %c1_i32 : i32 to vector<128x128xi32>
    %3 = arith.addi %0, %2 : vector<128x128xi32>
    %4 = arith.cmpi eq, %1, %3 : vector<128x128xi32>
    %cst = arith.constant 1.000000e+00 : f32
    %cst_0 = arith.constant 0.000000e+00 : f32
    %5 = vector.broadcast %cst : f32 to vector<128x128xf32>
    %6 = vector.broadcast %cst_0 : f32 to vector<128x128xf32>
    %7 = arith.select %4, %5, %6 : vector<128x128xi1>, vector<128x128xf32>
    %8 = arith.truncf %7 : vector<128x128xf32> to vector<128x128xbf16>
    %c1_i32_1 = arith.constant 1 : i32
    %9 = vector.broadcast %c1_i32_1 : i32 to vector<128x128xi32>
    %10 = arith.addi %1, %9 : vector<128x128xi32>
    %11 = arith.cmpi eq, %0, %10 : vector<128x128xi32>
    %cst_2 = arith.constant 1.000000e+00 : f32
    %cst_3 = arith.constant 0.000000e+00 : f32
    %12 = vector.broadcast %cst_2 : f32 to vector<128x128xf32>
    %13 = vector.broadcast %cst_3 : f32 to vector<128x128xf32>
    %14 = arith.select %11, %12, %13 : vector<128x128xi1>, vector<128x128xf32>
    %15 = arith.truncf %14 : vector<128x128xf32> to vector<128x128xbf16>
    %c0 = arith.constant 0 : index
    %c0_4 = arith.constant 0 : index
    %16 = vector.load %arg2[%c0, %c0_4] : memref<32x48xbf16, #tpu.memory_space<vmem>>, vector<32x48xbf16>
    %c0_5 = arith.constant 0 : index
    %c0_6 = arith.constant 0 : index
    %17 = vector.load %arg4[%c0_5, %c0_6] : memref<32x96xbf16, #tpu.memory_space<vmem>>, vector<32x96xbf16>
    %c0_7 = arith.constant 0 : index
    %c0_8 = arith.constant 0 : index
    %18 = vector.load %arg6[%c0_7, %c0_8] : memref<32x16xbf16, #tpu.memory_space<vmem>>, vector<32x16xbf16>
    %c0_9 = arith.constant 0 : index
    %c0_10 = arith.constant 0 : index
    %19 = vector.load %arg3[%c0_9, %c0_10] : memref<32x1xf32, #tpu.memory_space<vmem>>, vector<32x1xf32>
    %c0_11 = arith.constant 0 : index
    %c0_12 = arith.constant 0 : index
    %20 = vector.load %arg5[%c0_11, %c0_12] : memref<32x1xf32, #tpu.memory_space<vmem>>, vector<32x1xf32>
    %c0_13 = arith.constant 0 : index
    %c0_14 = arith.constant 0 : index
    %21 = vector.load %arg7[%c0_13, %c0_14] : memref<32x1xf32, #tpu.memory_space<vmem>>, vector<32x1xf32>
    %c0_15 = arith.constant 0 : index
    %c0_16 = arith.constant 0 : index
    %c0_17 = arith.constant 0 : index
    %22 = vector.load %arg1[%c0_15, %c0_16, %c0_17] : memref<2x16x128xbf16, #tpu.memory_space<vmem>>, vector<1x16x128xbf16>
    %23 = vector.shape_cast %22 : vector<1x16x128xbf16> to vector<16x128xbf16>
    %cst_18 = arith.constant dense<0.000000e+00> : vector<16x128xf32>
    %24 = tpu.matmul %23, %8, %cst_18 {dimension_numbers = #tpu.dot_dimension_numbers<[1], [0], [0], [1], [0, 0, 1, 1], [], []>} : vector<16x128xbf16>, vector<128x128xbf16>, vector<16x128xf32> -> vector<16x128xf32>
    %25 = arith.truncf %24 : vector<16x128xf32> to vector<16x128xbf16>
    %cst_19 = arith.constant dense<0.000000e+00> : vector<16x128xf32>
    %26 = tpu.matmul %23, %15, %cst_19 {dimension_numbers = #tpu.dot_dimension_numbers<[1], [0], [0], [1], [0, 0, 1, 1], [], []>} : vector<16x128xbf16>, vector<128x128xbf16>, vector<16x128xf32> -> vector<16x128xf32>
    %27 = arith.truncf %26 : vector<16x128xf32> to vector<16x128xbf16>
    %28 = tpu.concatenate %25, %23, %27 in 0 : vector<16x128xbf16>, vector<16x128xbf16>, vector<16x128xbf16> -> vector<48x128xbf16>
    %cst_20 = arith.constant dense<0.000000e+00> : vector<32x128xf32>
    %29 = tpu.matmul %16, %28, %cst_20 {dimension_numbers = #tpu.dot_dimension_numbers<[1], [0], [0], [1], [0, 0, 1, 1], [], []>} : vector<32x48xbf16>, vector<48x128xbf16>, vector<32x128xf32> -> vector<32x128xf32>
    %30 = vector.broadcast %19 : vector<32x1xf32> to vector<32x128xf32>
    %31 = arith.addf %29, %30 : vector<32x128xf32>
    %cst_21 = arith.constant 0.000000e+00 : f32
    %32 = vector.broadcast %cst_21 : f32 to vector<32x128xf32>
    %33 = arith.maximumf %31, %32 : vector<32x128xf32>
    %34 = arith.truncf %33 : vector<32x128xf32> to vector<32x128xbf16>
    %cst_22 = arith.constant dense<0.000000e+00> : vector<32x128xf32>
    %35 = tpu.matmul %34, %8, %cst_22 {dimension_numbers = #tpu.dot_dimension_numbers<[1], [0], [0], [1], [0, 0, 1, 1], [], []>} : vector<32x128xbf16>, vector<128x128xbf16>, vector<32x128xf32> -> vector<32x128xf32>
    %36 = arith.truncf %35 : vector<32x128xf32> to vector<32x128xbf16>
    %cst_23 = arith.constant dense<0.000000e+00> : vector<32x128xf32>
    %37 = tpu.matmul %34, %15, %cst_23 {dimension_numbers = #tpu.dot_dimension_numbers<[1], [0], [0], [1], [0, 0, 1, 1], [], []>} : vector<32x128xbf16>, vector<128x128xbf16>, vector<32x128xf32> -> vector<32x128xf32>
    %38 = arith.truncf %37 : vector<32x128xf32> to vector<32x128xbf16>
    %39 = tpu.concatenate %36, %34, %38 in 0 : vector<32x128xbf16>, vector<32x128xbf16>, vector<32x128xbf16> -> vector<96x128xbf16>
    %cst_24 = arith.constant dense<0.000000e+00> : vector<32x128xf32>
    %40 = tpu.matmul %17, %39, %cst_24 {dimension_numbers = #tpu.dot_dimension_numbers<[1], [0], [0], [1], [0, 0, 1, 1], [], []>} : vector<32x96xbf16>, vector<96x128xbf16>, vector<32x128xf32> -> vector<32x128xf32>
    %41 = vector.broadcast %20 : vector<32x1xf32> to vector<32x128xf32>
    %42 = arith.addf %40, %41 : vector<32x128xf32>
    %cst_25 = arith.constant 0.000000e+00 : f32
    %43 = vector.broadcast %cst_25 : f32 to vector<32x128xf32>
    %44 = arith.maximumf %42, %43 : vector<32x128xf32>
    %cst_26 = arith.constant dense<0.000000e+00> : vector<32x128xf32>
    %45 = tpu.matmul %18, %23, %cst_26 {dimension_numbers = #tpu.dot_dimension_numbers<[1], [0], [0], [1], [0, 0, 1, 1], [], []>} : vector<32x16xbf16>, vector<16x128xbf16>, vector<32x128xf32> -> vector<32x128xf32>
    %46 = vector.broadcast %21 : vector<32x1xf32> to vector<32x128xf32>
    %47 = arith.addf %45, %46 : vector<32x128xf32>
    %cst_27 = arith.constant 0.000000e+00 : f32
    %48 = vector.broadcast %cst_27 : f32 to vector<32x128xf32>
    %49 = arith.maximumf %47, %48 : vector<32x128xf32>
    %50 = arith.addf %44, %49 : vector<32x128xf32>
    %c0_28 = arith.constant 0 : index
    %c0_29 = arith.constant 0 : index
    %c0_30 = arith.constant 0 : index
    %51 = vector.load %arg8[%c0_28, %c0_29, %c0_30] : memref<2x32x128xf32, #tpu.memory_space<vmem>>, vector<1x32x128xf32>
    %52 = vector.shape_cast %51 : vector<1x32x128xf32> to vector<32x128xf32>
    %53 = vector.shape_cast %50 : vector<32x128xf32> to vector<1x32x128xf32>
    tpu.vector_store %arg8[%c0_28, %c0_29, %c0_30], %53 {strides = array<i32>} : memref<2x32x128xf32, #tpu.memory_space<vmem>>, vector<1x32x128xf32>,
    %c1 = arith.constant 1 : index
    %c0_31 = arith.constant 0 : index
    %c0_32 = arith.constant 0 : index
    %54 = vector.load %arg1[%c1, %c0_31, %c0_32] : memref<2x16x128xbf16, #tpu.memory_space<vmem>>, vector<1x16x128xbf16>
    %55 = vector.shape_cast %54 : vector<1x16x128xbf16> to vector<16x128xbf16>
    %cst_33 = arith.constant dense<0.000000e+00> : vector<16x128xf32>
    %56 = tpu.matmul %55, %8, %cst_33 {dimension_numbers = #tpu.dot_dimension_numbers<[1], [0], [0], [1], [0, 0, 1, 1], [], []>} : vector<16x128xbf16>, vector<128x128xbf16>, vector<16x128xf32> -> vector<16x128xf32>
    %57 = arith.truncf %56 : vector<16x128xf32> to vector<16x128xbf16>
    %cst_34 = arith.constant dense<0.000000e+00> : vector<16x128xf32>
    %58 = tpu.matmul %55, %15, %cst_34 {dimension_numbers = #tpu.dot_dimension_numbers<[1], [0], [0], [1], [0, 0, 1, 1], [], []>} : vector<16x128xbf16>, vector<128x128xbf16>, vector<16x128xf32> -> vector<16x128xf32>
    %59 = arith.truncf %58 : vector<16x128xf32> to vector<16x128xbf16>
    %60 = tpu.concatenate %57, %55, %59 in 0 : vector<16x128xbf16>, vector<16x128xbf16>, vector<16x128xbf16> -> vector<48x128xbf16>
    %cst_35 = arith.constant dense<0.000000e+00> : vector<32x128xf32>
    %61 = tpu.matmul %16, %60, %cst_35 {dimension_numbers = #tpu.dot_dimension_numbers<[1], [0], [0], [1], [0, 0, 1, 1], [], []>} : vector<32x48xbf16>, vector<48x128xbf16>, vector<32x128xf32> -> vector<32x128xf32>
    %62 = vector.broadcast %19 : vector<32x1xf32> to vector<32x128xf32>
    %63 = arith.addf %61, %62 : vector<32x128xf32>
    %cst_36 = arith.constant 0.000000e+00 : f32
    %64 = vector.broadcast %cst_36 : f32 to vector<32x128xf32>
    %65 = arith.maximumf %63, %64 : vector<32x128xf32>
    %66 = arith.truncf %65 : vector<32x128xf32> to vector<32x128xbf16>
    %cst_37 = arith.constant dense<0.000000e+00> : vector<32x128xf32>
    %67 = tpu.matmul %66, %8, %cst_37 {dimension_numbers = #tpu.dot_dimension_numbers<[1], [0], [0], [1], [0, 0, 1, 1], [], []>} : vector<32x128xbf16>, vector<128x128xbf16>, vector<32x128xf32> -> vector<32x128xf32>
    %68 = arith.truncf %67 : vector<32x128xf32> to vector<32x128xbf16>
    %cst_38 = arith.constant dense<0.000000e+00> : vector<32x128xf32>
    %69 = tpu.matmul %66, %15, %cst_38 {dimension_numbers = #tpu.dot_dimension_numbers<[1], [0], [0], [1], [0, 0, 1, 1], [], []>} : vector<32x128xbf16>, vector<128x128xbf16>, vector<32x128xf32> -> vector<32x128xf32>
    %70 = arith.truncf %69 : vector<32x128xf32> to vector<32x128xbf16>
    %71 = tpu.concatenate %68, %66, %70 in 0 : vector<32x128xbf16>, vector<32x128xbf16>, vector<32x128xbf16> -> vector<96x128xbf16>
    %cst_39 = arith.constant dense<0.000000e+00> : vector<32x128xf32>
    %72 = tpu.matmul %17, %71, %cst_39 {dimension_numbers = #tpu.dot_dimension_numbers<[1], [0], [0], [1], [0, 0, 1, 1], [], []>} : vector<32x96xbf16>, vector<96x128xbf16>, vector<32x128xf32> -> vector<32x128xf32>
    %73 = vector.broadcast %20 : vector<32x1xf32> to vector<32x128xf32>
    %74 = arith.addf %72, %73 : vector<32x128xf32>
    %cst_40 = arith.constant 0.000000e+00 : f32
    %75 = vector.broadcast %cst_40 : f32 to vector<32x128xf32>
    %76 = arith.maximumf %74, %75 : vector<32x128xf32>
    %cst_41 = arith.constant dense<0.000000e+00> : vector<32x128xf32>
    %77 = tpu.matmul %18, %55, %cst_41 {dimension_numbers = #tpu.dot_dimension_numbers<[1], [0], [0], [1], [0, 0, 1, 1], [], []>} : vector<32x16xbf16>, vector<16x128xbf16>, vector<32x128xf32> -> vector<32x128xf32>
    %78 = vector.broadcast %21 : vector<32x1xf32> to vector<32x128xf32>
    %79 = arith.addf %77, %78 : vector<32x128xf32>
    %cst_42 = arith.constant 0.000000e+00 : f32
    %80 = vector.broadcast %cst_42 : f32 to vector<32x128xf32>
    %81 = arith.maximumf %79, %80 : vector<32x128xf32>
    %82 = arith.addf %76, %81 : vector<32x128xf32>
    %c1_43 = arith.constant 1 : index
    %c0_44 = arith.constant 0 : index
    %c0_45 = arith.constant 0 : index
    %83 = vector.load %arg8[%c1_43, %c0_44, %c0_45] : memref<2x32x128xf32, #tpu.memory_space<vmem>>, vector<1x32x128xf32>
    %84 = vector.shape_cast %83 : vector<1x32x128xf32> to vector<32x128xf32>
    %85 = vector.shape_cast %82 : vector<32x128xf32> to vector<1x32x128xf32>
    tpu.vector_store %arg8[%c1_43, %c0_44, %c0_45], %85 {strides = array<i32>} : memref<2x32x128xf32, #tpu.memory_space<vmem>>, vector<1x32x128xf32>,
    return
  }
  func.func @transform_0(%arg0: i32) -> (i32, i32, i32) {
    %c0_i32 = arith.constant 0 : i32
    %c0_i32_0 = arith.constant 0 : i32
    %c0_i32_1 = arith.constant 0 : i32
    return %arg0, %c0_i32, %c0_i32_0 : i32, i32, i32
  }
  func.func @transform_1(%arg0: i32) -> (i32, i32) {
    %c0_i32 = arith.constant 0 : i32
    %c0_i32_0 = arith.constant 0 : i32
    %c0_i32_1 = arith.constant 0 : i32
    return %c0_i32, %c0_i32_0 : i32, i32
  }
  func.func @transform_2(%arg0: i32) -> (i32, i32) {
    %c0_i32 = arith.constant 0 : i32
    %c0_i32_0 = arith.constant 0 : i32
    %c0_i32_1 = arith.constant 0 : i32
    return %c0_i32, %c0_i32_0 : i32, i32
  }
  func.func @transform_3(%arg0: i32) -> (i32, i32) {
    %c0_i32 = arith.constant 0 : i32
    %c0_i32_0 = arith.constant 0 : i32
    %c0_i32_1 = arith.constant 0 : i32
    return %c0_i32, %c0_i32_0 : i32, i32
  }
  func.func @transform_4(%arg0: i32) -> (i32, i32) {
    %c0_i32 = arith.constant 0 : i32
    %c0_i32_0 = arith.constant 0 : i32
    %c0_i32_1 = arith.constant 0 : i32
    return %c0_i32, %c0_i32_0 : i32, i32
  }
  func.func @transform_5(%arg0: i32) -> (i32, i32) {
    %c0_i32 = arith.constant 0 : i32
    %c0_i32_0 = arith.constant 0 : i32
    %c0_i32_1 = arith.constant 0 : i32
    return %c0_i32, %c0_i32_0 : i32, i32
  }
  func.func @transform_6(%arg0: i32) -> (i32, i32) {
    %c0_i32 = arith.constant 0 : i32
    %c0_i32_0 = arith.constant 0 : i32
    %c0_i32_1 = arith.constant 0 : i32
    return %c0_i32, %c0_i32_0 : i32, i32
  }
  func.func @transform_7(%arg0: i32) -> (i32, i32, i32) {
    %c0_i32 = arith.constant 0 : i32
    %c0_i32_0 = arith.constant 0 : i32
    %c0_i32_1 = arith.constant 0 : i32
    return %arg0, %c0_i32, %c0_i32_0 : i32, i32, i32
  }
}

</mosaic_0001>

<bundles_post_ra>
// kernel: tpu_custom_call.1
= control target key start
LH: loop header
LB: loop body
LE: loop exit
PB: predicated region body
PF: predicated region fallthrough
CT: control target
= control target key end

     0   :  { %12 = vsyncpa [#allocation3], 0  ;;  %s2744_s0 = inlined_call_operand.vmem [shape: bf16[4,16,128], index: 0, kind: input, shape index: {}]   ;;  %s2745_s1 = inlined_call_operand.vmem [shape: bf16[32,48], index: 1, kind: input, shape index: {}]   ;;  %s2746_s2 = inlined_call_operand.vmem [shape: f32[32,1], index: 2, kind: input, shape index: {}]   ;;  %s2747_s3 = inlined_call_operand.vmem [shape: bf16[32,96], index: 3, kind: input, shape index: {}]   ;;  %s2748_s4 = inlined_call_operand.vmem [shape: f32[32,1], index: 4, kind: input, shape index: {}]   ;;  %s2749_s5 = inlined_call_operand.vmem [shape: bf16[32,16], index: 5, kind: input, shape index: {}]   ;;  %s2750_s6 = inlined_call_operand.vmem [shape: f32[32,1], index: 6, kind: input, shape index: {}]   ;;  %s2751_s7 = inlined_call_operand.hbm [shape: f32[4,32,128], index: 7, kind: output, shape index: {}]  }
   0x1   :  { %14 = vsyncpa [#allocation3 + $0x1], 0  ;;  %s2009_s24 = smov 0   ;;  %s2011_s25 = smov 0  }
   0x2   :  { %s2013_s26 = smov 0   ;;  %s2015_s27 = smov 0  }
   0x3 LB: > { %s2030_s28 = sadd.s32 4294967295, %s1960_s27   ;;  %s1340_s29 = sadd.s32 4294967294, %s1960_s27   ;;  %s1960_s27 = sphi %s2015_s27, %s2825_s27   ;;  %s1956_s26 = sphi %s2013_s26, %s2824_s26   ;;  %s1952_s25 = sphi %s2011_s25, %s2823_s25   ;;  %s1948_s24 = sphi %s2009_s24, %s2822_s24  }
   0x4   : > { %s2034_s30 = sadd.s32 1, %s1960_s27   ;;  %s179_s8 = sadd.s32 1, %s1956_s26 }
   0x5   : > { %s176_s9 = ssub.s32 %s1960_s27, %s2034_s30  ;;  %p189_p0 = scmp.ne.s32.totalorder %s1956_s26, %s1952_s25 }
   0x6   : > { %p177_p1 = scmp.eq.s32.totalorder %s176_s9, 0  ;;  %p190_p2 = scmp.eq.s32.totalorder %s2030_s28, 1 }
   0x7   : > { %p195_p3 = scmp.ne.s32.totalorder %s1952_s25, %s1948_s24  ;;  %p196_p4 = scmp.eq.s32.totalorder %s1340_s29, 1 }
   0x8   : > { %s2045_s10 = scalar_select %p177_p1, %s1956_s26, %s179_s8  }
   0x9   : > { %p2047_p5 = por %p190_p2, %p189_p0  ;;  %p2051_p6 = por %p196_p4, %p195_p3 }
   0xa   : > { %p1343_p7 = scmp.ge.s32.totalorder %s1960_s27, 1  ;;  %p242_p8 = scmp.lt.s32.totalorder %s1960_s27, 3 }
   0xc   : > { %p243_p9 = pnand %p1343_p7, %p242_p8 }
   0xd   : > { %v284_v0 = vlaneseq (!%p243_p9)  ;;  %s1345_s13 = sshll.u32 (!%p243_p9), %s2030_s28, 1  ;;  %v1962_v1 = vmov (!%p243_p9), 0.0   ;;  %vm2752_vm0 = vmmov (!%p243_p9), 0   ;;  %v2776_v16 = vmov (!%p243_p9), 0  ;;  %v2307_v54 = vld [vmem:[%s2745_s1] sm:$0xff] (!%p243_p9)   ;;  %v414_v56 = vld [vmem:[%s2746_s2 + $0x10] sm:$0xff] (!%p243_p9) }
   0xe   : > { %246 = sbr.rel (%p243_p9) target bundleno = 1696 (0x6a0), region = 48  ;;  %1619 = vmatprep.subr.bf16.mxu0 (!%p243_p9), %v1962_v1  ;;  %1639 = vmatprep.subr.bf16.mxu1 (!%p243_p9), %v1962_v1  ;;  %p276_p10 = scmp.lt.s32.totalorder (!%p243_p9), %s1345_s13, 3  ;;  %v1964_v19 = vmov (!%p243_p9), 1.0|1.0   ;;  %v2782_v22 = vmov (!%p243_p9), 0  ;;  %v2784_v27 = vmov (!%p243_p9), 0 }
   0xf   : > { %v2060_v2 = vshrl.u32 (!%p243_p9), %v284_v0, 7  ;;  %v2062_v3 = vand.u32 (!%p243_p9), 127, %v284_v0  ;;  %1635 = vmatprep.mubr.msk.bf16.mxu0 (!%p243_p9), %vm2752_vm0, %v1962_v1  ;;  %1655 = vmatprep.mubr.msk.bf16.mxu1 (!%p243_p9), %vm2752_vm0, %v1962_v1  ;;  %v2788_v33 = vmov (!%p243_p9), 0  ;;  %v2792_v39 = vmov (!%p243_p9), 0  ;;  %v412_v55 = vld [vmem:[%s2746_s2] sm:$0xff] (!%p243_p9)  ;;  %v413_v58 = vld [vmem:[%s2746_s2 + $0x8] sm:$0xff] (!%p243_p9) }
  0x10   : > { %v2796_v45 = vmov (!%p243_p9), 0  ;;  %v2800_v49 = vmov (!%p243_p9), 0  ;;  %v2802_v50 = vmov (!%p243_p9), 0  ;;  %v2804_v51 = vmov (!%p243_p9), 0  ;;  %v415_v59 = vld [vmem:[%s2746_s2 + $0x18] sm:$0xff] (!%p243_p9)  ;;  %v416_v60 = vld [vmem:[%s2748_s4] sm:$0xff] (!%p243_p9) }
  0x11   : > { %v286_v4 = vadd.s32 (!%p243_p9), 8, %v2060_v2  ;;  %v303_v5 = vadd.s32 (!%p243_p9), 1, %v2060_v2  ;;  %v287_v6 = vadd.s32 (!%p243_p9), 16, %v2060_v2  ;;  %v288_v7 = vadd.s32 (!%p243_p9), 24, %v2060_v2  ;;  %v417_v61 = vld [vmem:[%s2748_s4 + $0x8] sm:$0xff] (!%p243_p9)  ;;  %v418_v62 = vld [vmem:[%s2748_s4 + $0x10] sm:$0xff] (!%p243_p9) }
  0x12   : > { %v2073_v8 = vadd.s32 (!%p243_p9), 1, %v2062_v3  ;;  %v289_v9 = vadd.s32 (!%p243_p9), 32, %v2060_v2  ;;  %v290_v10 = vadd.s32 (!%p243_p9), 40, %v2060_v2  ;;  %v291_v17 = vadd.s32 (!%p243_p9), 48, %v2060_v2  ;;  %v419_v63 = vld [vmem:[%s2748_s4 + $0x18] sm:$0xff] (!%p243_p9)  ;;  %v420_v0 = vld [vmem:[%s2750_s6] sm:$0xff] (!%p243_p9) }
  0x13   : > { %v304_v11 = vadd.s32 (!%p243_p9), 1, %v286_v4  ;;  %vm319_vm1 = vcmp.eq.s32.totalorder (!%p243_p9), %v2062_v3, %v303_v5  ;;  %v305_v12 = vadd.s32 (!%p243_p9), 1, %v287_v6  ;;  %v306_v13 = vadd.s32 (!%p243_p9), 1, %v288_v7  ;;  %s1510_s16 = sshll.u32 (!%p243_p9), %s2030_s28, 10  ;;  %s1966_s23 = smov (!%p243_p9), [#allocation2]  }
  0x14   : > { %vm360_vm2 = vcmp.eq.s32.totalorder (!%p243_p9), %v2060_v2, %v2073_v8  ;;  %vm361_vm3 = vcmp.eq.s32.totalorder (!%p243_p9), %v286_v4, %v2073_v8  ;;  %v307_v14 = vadd.s32 (!%p243_p9), 1, %v289_v9  ;;  %v308_v15 = vadd.s32 (!%p243_p9), 1, %v290_v10  ;;  %v423_v4 = vld [vmem:[%s2750_s6 + $0x18] sm:$0xff] (!%p243_p9)  ;;  %s2694_s21 = scalar_lea.hbm (!%p243_p9), %s2751_s7, %s1510_s16  ;;  %s1902_s29 = sshll.u32 (!%p243_p9), %s1966_s23, 4  ;;  %s1903_s29 = int_to_ptr.vmem [resolvable:$false] %s1902_s29 }
  0x15   : > { %s2827_s13 = smov (!%p276_p10, %s1345_s13), 3  ;;  %vm320_vm4 = vcmp.eq.s32.totalorder %v2062_v3, %v304_v11  ;;  %vm321_vm5 = vcmp.eq.s32.totalorder %v2062_v3, %v305_v12  ;;  %vm322_vm6 = vcmp.eq.s32.totalorder %v2062_v3, %v306_v13  ;;  %vm2089_vm7 = vmpackc.low %vm361_vm3, %vm360_vm2  ;;  %vm362_vm9 = vcmp.eq.s32.totalorder %v287_v6, %v2073_v8  ;;  %s1904_s8 = scalar_lea.vmem %s1903_s29, 2048 }
  0x16   : > { %s1508_s14 = sshll.u32 %s2827_s13, 3  ;;  %v2777_v16 = vsel %vm2089_vm7, 4294967295, %v2776_v16  ;;  %vm2094_vm8 = vmpackc.low %vm320_vm4, %vm319_vm1  ;;  %1640 = vmatpush3.bf16.msk.msra.mxu1 %vm2089_vm7, %v1964_v19  ;;  %vm363_vm10 = vcmp.eq.s32.totalorder %v288_v7, %v2073_v8  ;;  %v292_v20 = vadd.s32 56, %v2060_v2  ;;  %vm323_vm12 = vcmp.eq.s32.totalorder %v2062_v3, %v307_v14  ;;  %s272_s13 = sand.u32 1, %s1952_s25  }
  0x17   : > { %s2081_s17 = scalar_lea.vmem %s2744_s0, %s1508_s14  ;;  %1620 = vmatpush3.bf16.msk.msra.mxu0 %vm2094_vm8, %v1964_v19  ;;  %1641 = vmatprep.subr.bf16.mxu1 %v1962_v1  ;;  %vm2109_vm11 = vmpackc.low %vm322_vm6, %vm321_vm5  ;;  %vm324_vm13 = vcmp.eq.s32.totalorder %v2062_v3, %v308_v15  ;;  %vm364_vm14 = vcmp.eq.s32.totalorder %v289_v9, %v2073_v8  ;;  %vm365_vm15 = vcmp.eq.s32.totalorder %v290_v10, %v2073_v8  ;;  %v309_v23 = vadd.s32 1, %v291_v17  ;;  %v2352_v15 = vld [vmem:[%s2745_s1 + $0x8] sm:$0xff]   ;;  %s1344_s14 = sshll.u32 %s272_s13, 6 }
  0x18   : > { %1621 = vmatprep.subr.bf16.mxu0 %v1962_v1  ;;  %vm2117_vm1 = vmpackc.low %vm363_vm10, %vm362_vm9  ;;  %v310_v24 = vadd.s32 1, %v292_v20  ;;  %v293_v25 = vadd.s32 64, %v2060_v2  ;;  %v294_v26 = vadd.s32 72, %v2060_v2  ;;  %vm366_vm4 = vcmp.eq.s32.totalorder %v291_v17, %v2073_v8  ;;  %v2246_v53 = vld [vmem:[%s2081_s17] sm:$0xff]   ;;  %s2610_s15 = scalar_lea.vmem [#allocation2], %s1344_s14  ;;  %s2703_s28 = scalar_lea.sflag [#allocation3], %s272_s13 }
  0x19   : > { %v2783_v22 = vsel %vm2117_vm1, 4294967295, %v2782_v22  ;;  %vm2130_vm2 = vmpackc.low %vm365_vm15, %vm364_vm14  ;;  %vm367_vm5 = vcmp.eq.s32.totalorder %v292_v20, %v2073_v8  ;;  %v295_v29 = vadd.s32 80, %v2060_v2  ;;  %v296_v30 = vadd.s32 88, %v2060_v2  ;;  %s1278_s18 = sshll.u32 %s2610_s15, 4  ;;  %s2696_s18 = int_to_ptr.vmem [resolvable:$true] %s1278_s18 }
  0x1a   : > { %1642 = vmatpush3.bf16.msk.msra.mxu1 %vm2117_vm1, %v1964_v19  ;;  %v2785_v27 = vsel %vm2130_vm2, 4294967295, %v2784_v27  ;;  %vm2135_vm3 = vmpackc.low %vm324_vm13, %vm323_vm12  ;;  %vm325_vm6 = vcmp.eq.s32.totalorder %v2062_v3, %v309_v23  ;;  %vm326_vm9 = vcmp.eq.s32.totalorder %v2062_v3, %v310_v24  ;;  %v311_v31 = vadd.s32 1, %v293_v25  ;;  %s1898_s22 = scalar_lea.vmem %s2696_s18, 1024  ;;  %p1905_p0 = scmp.lt.s32.totalorder %s2696_s18, %s1903_s29 }
  0x1b   : > { %1622 = vmatpush3.bf16.msk.msra.mxu0 %vm2109_vm11, %v1964_v19  ;;  %1643 = vmatprep.subr.bf16.mxu1 %v1962_v1  ;;  %v312_v32 = vadd.s32 1, %v294_v26  ;;  %vm2152_vm10 = vmpackc.low %vm367_vm5, %vm366_vm4  ;;  %v313_v35 = vadd.s32 1, %v295_v29  ;;  %v314_v36 = vadd.s32 1, %v296_v30  ;;  %vm368_vm13 = vcmp.eq.s32.totalorder %v293_v25, %v2073_v8  ;;  %p1899_p11 = scmp.ne.s32.totalorder %s2696_s18, %s1898_s22  ;;  %p1906_p1 = scmp.lt.s32.totalorder %s1904_s8, %s1898_s22 }
  0x1c   : > { %1623 = vmatprep.subr.bf16.mxu0 %v1962_v1  ;;  %v2789_v33 = vsel %vm2152_vm10, 4294967295, %v2788_v33  ;;  %vm2157_vm12 = vmpackc.low %vm326_vm9, %vm325_vm6  ;;  %vm369_vm14 = vcmp.eq.s32.totalorder %v294_v26, %v2073_v8  ;;  %vm327_vm15 = vcmp.eq.s32.totalorder %v2062_v3, %v311_v31  ;;  %v297_v37 = vadd.s32 96, %v2060_v2 }
  0x1d   : > { %vm328_vm0 = vcmp.eq.s32.totalorder %v2062_v3, %v312_v32  ;;  %v298_v38 = vadd.s32 104, %v2060_v2  ;;  %vm2174_vm4 = vmpackc.low %vm369_vm14, %vm368_vm13  ;;  %vm329_vm6 = vcmp.eq.s32.totalorder %v2062_v3, %v313_v35  ;;  %vm330_vm9 = vcmp.eq.s32.totalorder %v2062_v3, %v314_v36  ;;  %p1900_p12 = pnand %p1899_p11, %p2047_p5  ;;  %p1907_p2 = por %p1906_p1, %p1905_p0 }
  0x1e   : > { %1644 = vmatpush3.bf16.msk.msra.mxu1 %vm2130_vm2, %v1964_v19  ;;  %v2793_v39 = vsel %vm2174_vm4, 4294967295, %v2792_v39  ;;  %vm2179_vm5 = vmpackc.low %vm328_vm0, %vm327_vm15  ;;  %vm371_vm2 = vcmp.eq.s32.totalorder %v296_v30, %v2073_v8  ;;  %v315_v41 = vadd.s32 1, %v297_v37  ;;  %v299_v43 = vadd.s32 112, %v2060_v2 }
  0x1f   : > { %1624 = vmatpush3.bf16.msk.msra.mxu0 %vm2135_vm3, %v1964_v19  ;;  %1645 = vmatprep.subr.bf16.mxu1 %v1962_v1  ;;  %v316_v42 = vadd.s32 1, %v298_v38  ;;  %v300_v44 = vadd.s32 120, %v2060_v2  ;;  %vm2201_vm13 = vmpackc.low %vm330_vm9, %vm329_vm6  ;;  %vm372_vm14 = vcmp.eq.s32.totalorder %v297_v37, %v2073_v8  ;;  %vm373_vm15 = vcmp.eq.s32.totalorder %v298_v38, %v2073_v8  ;;  %v421_v2 = vld [vmem:[%s2750_s6 + $0x8] sm:$0xff]  ;;  %p1901_p13 = pneg %p1900_p12 }
  0x20   : > { %1625 = vmatprep.subr.bf16.mxu0 %v1962_v1  ;;  %v317_v47 = vadd.s32 1, %v299_v43  ;;  %vm374_vm6 = vcmp.eq.s32.totalorder %v299_v43, %v2073_v8  ;;  %v1965_v57 = vmov 0  }
  0x21   : > { %vm332_vm1 = vcmp.eq.s32.totalorder %v2062_v3, %v316_v42  ;;  %v318_v48 = vadd.s32 1, %v300_v44  ;;  %vm375_vm9 = vcmp.eq.s32.totalorder %v300_v44, %v2073_v8  ;;  %1888 = vset.pattern.permute.xlu0 %v1965_v57  ;;  %1889 = vset.pattern.permute.xlu1 %v1965_v57  ;;  %p1908_p3 = pnand %p1907_p2, %p1901_p13 }
  0x22   : > { %1646 = vmatpush3.bf16.msk.msra.mxu1 %vm2152_vm10, %v1964_v19  ;;  %vm370_vm10 = vcmp.eq.s32.totalorder %v295_v29, %v2073_v8  ;;  %518 = vperm.xlu0 %1888, %v412_v55   ;;  %v2474_v55 = vld [vmem:[%s2081_s17 + $0x8] sm:$0xff]  }
  0x23   : > { %1626 = vmatpush3.bf16.msk.msra.mxu0 %vm2157_vm12, %v1964_v19  ;;  %1647 = vmatprep.subr.bf16.mxu1 %v1962_v1  ;;  %vm2196_vm0 = vmpackc.low %vm371_vm2, %vm370_vm10  ;;  %vm334_vm7 = vcmp.eq.s32.totalorder %v2062_v3, %v318_v48  ;;  %v2429_v48 = vld [vmem:[%s2749_s5 + $0x8] sm:$0xff]  }
  0x24   : > { %1627 = vmatprep.subr.bf16.mxu0 %v1962_v1  ;;  %v2797_v45 = vsel %vm2196_vm0, 4294967295, %v2796_v45  ;;  %vm2216_vm2 = vmpackc.low %vm373_vm15, %vm372_vm14  ;;  %528 = vperm.xlu1 %1889, %v414_v56   ;;  %vm2809_vm14 = vnez %v2783_v22  ;;  %vm2810_vm15 = vnez %v2785_v27 }
  0x25   : > { %v2801_v49 = vsel %vm2216_vm2, 4294967295, %v2800_v49 }
  0x26   : > { %1648 = vmatpush3.bf16.msk.msra.mxu1 %vm2174_vm4, %v1964_v19  ;;  %vm331_vm4 = vcmp.eq.s32.totalorder %v2062_v3, %v315_v41  ;;  %523 = vperm.xlu0 %1888, %v413_v58  }
  0x27   : > { %1628 = vmatpush3.bf16.msk.msra.mxu0 %vm2179_vm5, %v1964_v19  ;;  %1649 = vmatprep.subr.bf16.mxu1 %v1962_v1  ;;  %vm2221_vm10 = vmpackc.low %vm332_vm1, %vm331_vm4 }
  0x28   : > { %1629 = vmatprep.subr.bf16.mxu0 %v1962_v1  ;;  %v2803_v50 = vsel %vm2221_vm10, 4294967295, %v2802_v50  ;;  %vm2236_vm1 = vmpackc.low %vm375_vm9, %vm374_vm6  ;;  %533 = vperm.xlu1 %1889, %v415_v59   ;;  %vm2811_vm6 = vnez %v2789_v33  ;;  %vm2812_vm9 = vnez %v2793_v39 }
  0x29   : > { %v2805_v51 = vsel %vm2236_vm1, 4294967295, %v2804_v51 }
  0x2a   : > { %1650 = vmatpush3.bf16.msk.msra.mxu1 %vm2196_vm0, %v1964_v19  ;;  %vm333_vm0 = vcmp.eq.s32.totalorder %v2062_v3, %v317_v47  ;;  %712 = vperm.xlu0 %1888, %v416_v60   ;;  %v422_v3 = vld [vmem:[%s2750_s6 + $0x10] sm:$0xff]  ;;  %v2420_v47 = vld [vmem:[%s2749_s5] sm:$0xff]  }
  0x2b   : > { %1630 = vmatpush3.bf16.msk.msra.mxu0 %vm2201_vm13, %v1964_v19  ;;  %1651 = vmatprep.subr.bf16.mxu1 %v1962_v1  ;;  %vm2241_vm4 = vmpackc.low %vm334_vm7, %vm333_vm0  ;;  %vm2766_vm7 = vcmask 392192   ;;  %vm2808_vm0 = vnez %v2777_v16 }
  0x2c   : > { %1631 = vmatprep.subr.bf16.mxu0 %v1962_v1  ;;  %717 = vperm.xlu1 %1889, %v417_v61  }
  0x2e   : > { %1652 = vmatpush3.bf16.msk.msra.mxu1 %vm2216_vm2, %v1964_v19  ;;  %722 = vperm.xlu0 %1888, %v418_v62  }
  0x2f   : > { %1632 = vmatpush3.bf16.msk.msra.mxu0 %vm2221_vm10, %v1964_v19  ;;  %1653 = vmatprep.subr.bf16.mxu1 %v1962_v1 }
  0x30   : > { %1633 = vmatprep.subr.bf16.mxu0 %v1962_v1  ;;  %727 = vperm.xlu1 %1889, %v419_v63  }
  0x32   : > { %1654 = vmatpush3.bf16.msk.msra.mxu1 %vm2236_vm1, %v1964_v19  ;;  %802 = vperm.xlu0 %1888, %v420_v0  }
  0x33   : > { %1634 = vmatpush3.bf16.msk.msra.mxu0 %vm2241_vm4, %v1964_v19  ;;  %1669 = vmatprep.subr.msk.bf16.mxu1 %vm2094_vm8, %v1964_v19 }
  0x34   : > { %807 = vperm.xlu1 %1889, %v421_v2  }
  0x35   : > { %1656 = vmatmul.mubr.bf16.vlgmr.msra.gmra.mrb[0].mxu1 %v2246_v53 }
  0x36   : > { %1636 = vmatmul.mubr.bf16.vlgmr.msra.gmra.mrb[0].mxu0 %v2246_v53  ;;  %1670 = vmatpush3.bf16.msk.msra.mxu1 %vm2094_vm8, %v1964_v19 }
  0x37   : > { %1671 = vmatprep.subr.msk.bf16.mxu1 %vm2109_vm11, %v1964_v19  ;;  %1665 = vmatprep.mubr.msk.bf16.mxu0 %vm2766_vm7, %v2307_v54 }
  0x38   : > { %812 = vperm.xlu0 %1888, %v422_v3   ;;  %817 = vperm.xlu1 %1889, %v423_v4  }
  0x3a   : > { %1672 = vmatpush3.bf16.msk.msra.mxu1 %vm2109_vm11, %v1964_v19 }
  0x3b   : > { %1673 = vmatprep.subr.msk.bf16.mxu1 %vm2135_vm3, %v1964_v19 }
  0x3e   : > { %1674 = vmatpush3.bf16.msk.msra.mxu1 %vm2135_vm3, %v1964_v19 }
  0x3f   : > { %1675 = vmatprep.subr.msk.bf16.mxu1 %vm2157_vm12, %v1964_v19 }
  0x42   : > { %1676 = vmatpush3.bf16.msk.msra.mxu1 %vm2157_vm12, %v1964_v19 }
  0x43   : > { %1677 = vmatprep.subr.msk.bf16.mxu1 %vm2179_vm5, %v1964_v19 }
  0x46   : > { %1678 = vmatpush3.bf16.msk.msra.mxu1 %vm2179_vm5, %v1964_v19 }
  0x47   : > { %1679 = vmatprep.subr.msk.bf16.mxu1 %vm2201_vm13, %v1964_v19 }
  0x4a   : > { %1680 = vmatpush3.bf16.msk.msra.mxu1 %vm2201_vm13, %v1964_v19 }
  0x4b   : > { %1681 = vmatprep.subr.msk.bf16.mxu1 %vm2221_vm10, %v1964_v19 }
  0x4e   : > { %1682 = vmatpush3.bf16.msk.msra.mxu1 %vm2221_vm10, %v1964_v19 }
  0x4f   : > { %1683 = vmatprep.subr.msk.bf16.mxu1 %vm2241_vm4, %v1964_v19 }
  0x52   : > { %1684 = vmatpush3.bf16.msk.msra.mxu1 %vm2241_vm4, %v1964_v19 }
  0xa1   : > { %v2407_v20 = vpop.permute.xlu0 %518 }
  0xa3   : > { %v2405_v17 = vpop.permute.xlu1 %528 }
  0xa5   : > { %v2413_v31 = vpop.permute.xlu0 %523 }
  0xa7   : > { %v2410_v26 = vpop.permute.xlu1 %533 }
  0xa9   : > { %v2579_v40 = vpop.permute.xlu0 %712 }
  0xab   : > { %v2581_v46 = vpop.permute.xlu1 %717 }
  0xaf   : > { %v2585_v52 = vpop.permute.xlu1 %727 }
 0x108   : > { %v508_v5 = vpop.f32.mrb[0].mxu1 }
 0x109   : > { %v466_v6 = vpop.f32.mrb[0].mxu0  ;;  %v1657_v7 = vpop.f32.mrb[1].mxu1 }
 0x10a   : > { %v1637_v8 = vpop.f32.mrb[1].mxu0  ;;  %v511_v9 = vpop.f32.mrb[2].mxu1 }
 0x10b   : > { %v469_v10 = vpop.f32.mrb[2].mxu0  ;;  %v515_v11 = vpack.c.bf16 %v511_v9, %v508_v5  ;;  %v1658_v12 = vpop.f32.mrb[3].mxu1  ;;  %v2490_v8 = vld [vmem:[%s2747_s3 + $0x8] sm:$0xff]  }
 0x10c   : > { %v473_v13 = vpack.c.bf16 %v469_v10, %v466_v6  ;;  %v1638_v14 = vpop.f32.mrb[3].mxu0  ;;  %v2589_v10 = vpop.permute.xlu1 %807 }
 0x10e   : > { %1659 = vmatprep.subr.bf16.mxu0 %v473_v13 }
 0x10f   : > { %1660 = vmatpush3.bf16.msra.mxu0 %v473_v13 }
 0x110   : > { %1661 = vmatprep.subr.bf16.mxu0 %v2246_v53  ;;  %v2596_v13 = vpop.permute.xlu1 %817 }
 0x113   : > { %1662 = vmatpush3.bf16.msra.mxu0 %v2246_v53 }
 0x114   : > { %1663 = vmatprep.subr.bf16.mxu0 %v515_v11 }
 0x117   : > { %1664 = vmatpush3.bf16.msra.mxu0 %v515_v11 }
 0x118   : > { %1689 = vmatprep.subr.msk.bf16.mxu0 %vm2808_vm0, %v1964_v19 }
 0x11a   : > { %1666 = vmatmul.mubr.msk.bf16.vlgmr.msra.gmra.mrb[4].mxu0 %vm2766_vm7, %v2352_v15  ;;  %vm2813_vm7 = vnez %v2797_v45 }
 0x11b   : > { %1690 = vmatpush3.bf16.msk.msra.mxu0 %vm2808_vm0, %v1964_v19 }
 0x11c   : > { %1691 = vmatprep.subr.msk.bf16.mxu0 %vm2809_vm14, %v1964_v19 }
 0x11f   : > { %1692 = vmatpush3.bf16.msk.msra.mxu0 %vm2809_vm14, %v1964_v19 }
 0x120   : > { %1693 = vmatprep.subr.msk.bf16.mxu0 %vm2810_vm15, %v1964_v19 }
 0x123   : > { %1694 = vmatpush3.bf16.msk.msra.mxu0 %vm2810_vm15, %v1964_v19 }
 0x124   : > { %1695 = vmatprep.subr.msk.bf16.mxu0 %vm2811_vm6, %v1964_v19 }
 0x127   : > { %1696 = vmatpush3.bf16.msk.msra.mxu0 %vm2811_vm6, %v1964_v19 }
 0x128   : > { %1697 = vmatprep.subr.msk.bf16.mxu0 %vm2812_vm9, %v1964_v19 }
 0x12b   : > { %1698 = vmatpush3.bf16.msk.msra.mxu0 %vm2812_vm9, %v1964_v19 }
 0x12c   : > { %1699 = vmatprep.subr.msk.bf16.mxu0 %vm2813_vm7, %v1964_v19 }
 0x12f   : > { %1700 = vmatpush3.bf16.msk.msra.mxu0 %vm2813_vm7, %v1964_v19 }
 0x130   : > { %1701 = vmatprep.subr.msk.bf16.mxu0 %vm2216_vm2, %v1964_v19 }
 0x133   : > { %1702 = vmatpush3.bf16.msk.msra.mxu0 %vm2216_vm2, %v1964_v19  ;;  %vm2814_vm2 = vmmov 0  }
 0x134   : > { %1703 = vmatprep.subr.msk.bf16.mxu0 %vm2236_vm1, %v1964_v19 }
 0x137   : > { %1704 = vmatpush3.bf16.msk.msra.mxu0 %vm2236_vm1, %v1964_v19  ;;  %vm2771_vm1 = vcmask 130048  }
 0x138   : > { %1725 = vmatprep.subr.bf16.mxu0 %v2246_v53 }
 0x1ed   : > { %v1667_v23 = vpop.f32.mrb[4].mxu0 }
 0x1ee   : > { %v596_v24 = vadd.f32 %v1667_v23, %v2405_v17  ;;  %v587_v25 = vpop.f32.mrb[5].mxu0 }
 0x1ef   : > { %v588_v29 = vadd.f32 %v587_v25, %v2407_v20  ;;  %v1668_v30 = vpop.f32.mrb[6].mxu0 }
 0x1f0   : > { %v599_v32 = vadd.f32 %v1668_v30, %v2410_v26  ;;  %v590_v35 = vpop.f32.mrb[7].mxu0  ;;  %v604_v37 = vmax.f32 %v596_v24, 0.0 }
 0x1f1   : > { %v591_v36 = vadd.f32 %v590_v35, %v2413_v31  ;;  %v602_v41 = vmax.f32 %v588_v29, 0.0 }
 0x1f2   : > { %v605_v38 = vmax.f32 %v599_v32, 0.0 }
 0x1f3   : > { %v603_v42 = vmax.f32 %v591_v36, 0.0 }
 0x1f4   : > { %v607_v43 = vpack.c.bf16 %v605_v38, %v604_v37 }
 0x1f5   : > { %v606_v44 = vpack.c.bf16 %v603_v42, %v602_v41 }
 0x1f7   : > { %1685 = vmatprep.mubr.bf16.mxu1 %v606_v44  ;;  %1705 = vmatprep.mubr.bf16.mxu0 %v606_v44 }
 0x1f8   : > { %1686 = vmatmul.mubr.bf16.vlgmr.msra.gmra.mrb[4].mxu1 %v607_v43  ;;  %1706 = vmatmul.mubr.bf16.vlgmr.msra.gmra.mrb[8].mxu0 %v607_v43 }
 0x1f9   : > { %1726 = vmatpush3.bf16.msra.mxu0 %v2246_v53  ;;  %1727 = vmatprep.mubr.msk.bf16.mxu0 %vm2771_vm1, %v2420_v47  ;;  %v2469_v53 = vld [vmem:[%s2747_s3] sm:$0xff]  }
 0x1fa   : > { %1731 = vmatprep.subr.bf16.mxu0 %v1962_v1 }
 0x200   : > { %1728 = vmatmul.mubr.msk.bf16.vlgmr.msra.gmra.mrb[12].mxu0 %vm2771_vm1, %v2429_v48  ;;  %vm740_vm1 = vcmask 785408  }
 0x201   : > { %1732 = vmatpush3.bf16.msk.msra.mxu0 %vm2094_vm8, %v1964_v19  ;;  %1747 = vmatprep.mubr.msk.bf16.mxu0 %vm2814_vm2, %v1962_v1 }
 0x202   : > { %1733 = vmatprep.subr.bf16.mxu0 %v1962_v1  ;;  %1721 = vmatprep.mubr.msk.bf16.mxu1 %vm740_vm1, %v2469_v53 }
 0x205   : > { %1734 = vmatpush3.bf16.msk.msra.mxu0 %vm2109_vm11, %v1964_v19 }
 0x206   : > { %1735 = vmatprep.subr.bf16.mxu0 %v1962_v1 }
 0x209   : > { %1736 = vmatpush3.bf16.msk.msra.mxu0 %vm2135_vm3, %v1964_v19 }
 0x20a   : > { %1737 = vmatprep.subr.bf16.mxu0 %v1962_v1 }
 0x20d   : > { %1738 = vmatpush3.bf16.msk.msra.mxu0 %vm2157_vm12, %v1964_v19 }
 0x20e   : > { %1739 = vmatprep.subr.bf16.mxu0 %v1962_v1 }
 0x211   : > { %1740 = vmatpush3.bf16.msk.msra.mxu0 %vm2179_vm5, %v1964_v19 }
 0x212   : > { %1741 = vmatprep.subr.bf16.mxu0 %v1962_v1 }
 0x215   : > { %1742 = vmatpush3.bf16.msk.msra.mxu0 %vm2201_vm13, %v1964_v19 }
 0x216   : > { %1743 = vmatprep.subr.bf16.mxu0 %v1962_v1 }
 0x219   : > { %1744 = vmatpush3.bf16.msk.msra.mxu0 %vm2221_vm10, %v1964_v19  ;;  %vm2815_vm10 = vcmask 392192  }
 0x21a   : > { %1745 = vmatprep.subr.bf16.mxu0 %v1962_v1 }
 0x21d   : > { %1746 = vmatpush3.bf16.msk.msra.mxu0 %vm2241_vm4, %v1964_v19 }
 0x220   : > { %1748 = vmatmul.mubr.bf16.vlgmr.msra.gmra.mrb[16].mxu0 %v2474_v55 }
 0x221   : > { %1777 = vmatprep.mubr.msk.bf16.mxu0 %vm2815_vm10, %v2307_v54  ;;  %vm2817_vm10 = vnez %v2805_v51 }
 0x2cb   : > { %v1687_v56 = vpop.f32.mrb[4].mxu1  ;;  %v1707_v57 = vpop.f32.mrb[8].mxu0 }
 0x2cc   : > { %v642_v58 = vpop.f32.mrb[5].mxu1  ;;  %v693_v59 = vpop.f32.mrb[9].mxu0 }
 0x2cd   : > { %v1688_v60 = vpop.f32.mrb[6].mxu1  ;;  %v1708_v61 = vpop.f32.mrb[10].mxu0 }
 0x2ce   : > { %v658_v62 = vpack.c.bf16 %v1688_v60, %v1687_v56  ;;  %v709_v63 = vpack.c.bf16 %v1708_v61, %v1707_v57  ;;  %v645_v0 = vpop.f32.mrb[7].mxu1  ;;  %v696_v2 = vpop.f32.mrb[11].mxu0 }
 0x2cf   : > { %v657_v3 = vpack.c.bf16 %v645_v0, %v642_v58  ;;  %v708_v4 = vpack.c.bf16 %v696_v2, %v693_v59 }
 0x2d1   : > { %1709 = vmatprep.subr.bf16.mxu1 %v657_v3 }
 0x2d2   : > { %1710 = vmatpush3.bf16.msra.mxu1 %v657_v3 }
 0x2d3   : > { %1711 = vmatprep.subr.bf16.mxu1 %v658_v62  ;;  %v2479_v5 = vpop.f32.mrb[12].mxu0 }
 0x2d4   : > { %v2481_v6 = vpop.f32.mrb[13].mxu0 }
 0x2d5   : > { %v2483_v54 = vpop.f32.mrb[14].mxu0 }
 0x2d6   : > { %1712 = vmatpush3.bf16.msra.mxu1 %v658_v62  ;;  %v2485_v7 = vpop.f32.mrb[15].mxu0  ;;  %v883_v24 = vadd.f32 %v2483_v54, %v2596_v13 }
 0x2d7   : > { %1713 = vmatprep.subr.bf16.mxu1 %v606_v44  ;;  %v875_v30 = vadd.f32 %v2485_v7, %v2589_v10 }
 0x2d8   : > { %v889_v56 = vmax.f32 %v883_v24, 0.0 }
 0x2d9   : > { %v887_v59 = vmax.f32 %v875_v30, 0.0 }
 0x2da   : > { %1714 = vmatpush3.bf16.msra.mxu1 %v606_v44 }
 0x2db   : > { %1715 = vmatprep.subr.bf16.mxu1 %v607_v43 }
 0x2de   : > { %1716 = vmatpush3.bf16.msra.mxu1 %v607_v43 }
 0x2df   : > { %1717 = vmatprep.subr.bf16.mxu1 %v708_v4 }
 0x2e2   : > { %1718 = vmatpush3.bf16.msra.mxu1 %v708_v4 }
 0x2e3   : > { %1719 = vmatprep.subr.bf16.mxu1 %v709_v63 }
 0x2e6   : > { %1720 = vmatpush3.bf16.msra.mxu1 %v709_v63 }
 0x2e7   : > { %1751 = vmatprep.subr.bf16.mxu1 %v1962_v1 }
 0x2e9   : > { %1722 = vmatmul.mubr.msk.bf16.vlgmr.msra.gmra.mrb[8].mxu1 %vm740_vm1, %v2490_v8 }
 0x2ea   : > { %1752 = vmatpush3.bf16.msk.msra.mxu1 %vm2808_vm0, %v1964_v19  ;;  %1767 = vmatprep.mubr.msk.bf16.mxu1 %vm2814_vm2, %v1962_v1  ;;  %vm2816_vm2 = vnez %v2801_v49 }
 0x2eb   : > { %1753 = vmatprep.subr.bf16.mxu1 %v1962_v1 }
 0x2ee   : > { %1754 = vmatpush3.bf16.msk.msra.mxu1 %vm2809_vm14, %v1964_v19 }
 0x2ef   : > { %1755 = vmatprep.subr.bf16.mxu1 %v1962_v1 }
 0x2f2   : > { %1756 = vmatpush3.bf16.msk.msra.mxu1 %vm2810_vm15, %v1964_v19 }
 0x2f3   : > { %1757 = vmatprep.subr.bf16.mxu1 %v1962_v1 }
 0x2f6   : > { %1758 = vmatpush3.bf16.msk.msra.mxu1 %vm2811_vm6, %v1964_v19 }
 0x2f7   : > { %1759 = vmatprep.subr.bf16.mxu1 %v1962_v1 }
 0x2fa   : > { %1760 = vmatpush3.bf16.msk.msra.mxu1 %vm2812_vm9, %v1964_v19 }
 0x2fb   : > { %1761 = vmatprep.subr.bf16.mxu1 %v1962_v1 }
 0x2fe   : > { %1762 = vmatpush3.bf16.msk.msra.mxu1 %vm2813_vm7, %v1964_v19 }
 0x2ff   : > { %1763 = vmatprep.subr.bf16.mxu1 %v1962_v1 }
 0x302   : > { %1764 = vmatpush3.bf16.msk.msra.mxu1 %vm2816_vm2, %v1964_v19 }
 0x303   : > { %1765 = vmatprep.subr.bf16.mxu1 %v1962_v1  ;;  %v941_v1 = vpop.f32.mrb[16].mxu0 }
 0x304   : > { %v1749_v18 = vpop.f32.mrb[17].mxu0 }
 0x305   : > { %v944_v21 = vpop.f32.mrb[18].mxu0 }
 0x306   : > { %1766 = vmatpush3.bf16.msk.msra.mxu1 %vm2817_vm10, %v1964_v19  ;;  %v948_v28 = vpack.c.bf16 %v944_v21, %v941_v1  ;;  %v1750_v34 = vpop.f32.mrb[19].mxu0 }
 0x307   : > { %1781 = vmatprep.subr.msk.bf16.mxu1 %vm2094_vm8, %v1964_v19 }
 0x308   : > { %1771 = vmatprep.subr.bf16.mxu0 %v948_v28 }
 0x309   : > { %1768 = vmatmul.mubr.bf16.vlgmr.msra.gmra.mrb[12].mxu1 %v2474_v55  ;;  %1772 = vmatpush3.bf16.msra.mxu0 %v948_v28 }
 0x30a   : > { %1782 = vmatpush3.bf16.msk.msra.mxu1 %vm2094_vm8, %v1964_v19  ;;  %vm2818_vm8 = vnez %v2803_v50  ;;  %1773 = vmatprep.subr.bf16.mxu0 %v2474_v55  ;;  %v2583_v50 = vpop.permute.xlu0 %722 }
 0x30b   : > { %1783 = vmatprep.subr.msk.bf16.mxu1 %vm2109_vm11, %v1964_v19 }
 0x30d   : > { %1774 = vmatpush3.bf16.msra.mxu0 %v2474_v55 }
 0x30e   : > { %1784 = vmatpush3.bf16.msk.msra.mxu1 %vm2109_vm11, %v1964_v19  ;;  %v2587_v9 = vpop.permute.xlu0 %802  ;;  %vm2819_vm11 = vcmask 392192  }
 0x30f   : > { %1785 = vmatprep.subr.msk.bf16.mxu1 %vm2135_vm3, %v1964_v19  ;;  %v872_v14 = vadd.f32 %v2481_v6, %v2587_v9 }
 0x311   : > { %v886_v42 = vmax.f32 %v872_v14, 0.0 }
 0x312   : > { %1786 = vmatpush3.bf16.msk.msra.mxu1 %vm2135_vm3, %v1964_v19  ;;  %v2591_v11 = vpop.permute.xlu0 %812  ;;  %vm2820_vm3 = vcmask 130048  }
 0x313   : > { %1787 = vmatprep.subr.msk.bf16.mxu1 %vm2157_vm12, %v1964_v19  ;;  %v880_v12 = vadd.f32 %v2479_v5, %v2591_v11 }
 0x315   : > { %v888_v36 = vmax.f32 %v880_v12, 0.0 }
 0x316   : > { %1788 = vmatpush3.bf16.msk.msra.mxu1 %vm2157_vm12, %v1964_v19  ;;  %vm2821_vm12 = vmmov %vm2820_vm3 }
 0x317   : > { %1789 = vmatprep.subr.msk.bf16.mxu1 %vm2179_vm5, %v1964_v19 }
 0x31a   : > { %1790 = vmatpush3.bf16.msk.msra.mxu1 %vm2179_vm5, %v1964_v19 }
 0x31b   : > { %1791 = vmatprep.subr.msk.bf16.mxu1 %vm2201_vm13, %v1964_v19 }
 0x31e   : > { %1792 = vmatpush3.bf16.msk.msra.mxu1 %vm2201_vm13, %v1964_v19 }
 0x31f   : > { %1793 = vmatprep.subr.msk.bf16.mxu1 %vm2818_vm8, %v1964_v19 }
 0x322   : > { %1794 = vmatpush3.bf16.msk.msra.mxu1 %vm2818_vm8, %v1964_v19 }
 0x323   : > { %1795 = vmatprep.subr.msk.bf16.mxu1 %vm2241_vm4, %v1964_v19 }
 0x326   : > { %1796 = vmatpush3.bf16.msk.msra.mxu1 %vm2241_vm4, %v1964_v19 }
 0x3bc   : > { %v1723_v23 = vpop.f32.mrb[8].mxu1 }
 0x3bd   : > { %v790_v25 = vadd.f32 %v1723_v23, %v2583_v50  ;;  %v781_v29 = vpop.f32.mrb[9].mxu1 }
 0x3be   : > { %v782_v32 = vadd.f32 %v781_v29, %v2579_v40  ;;  %v1724_v35 = vpop.f32.mrb[10].mxu1 }
 0x3bf   : > { %v798_v37 = vmax.f32 %v790_v25, 0.0  ;;  %v793_v38 = vadd.f32 %v1724_v35, %v2585_v52  ;;  %v784_v41 = vpop.f32.mrb[11].mxu1 }
 0x3c0   : > { %v796_v43 = vmax.f32 %v782_v32, 0.0  ;;  %v785_v44 = vadd.f32 %v784_v41, %v2581_v46 }
 0x3c1   : > { %v892_v57 = vadd.f32 %v888_v36, %v798_v37  ;;  %v799_v58 = vmax.f32 %v793_v38, 0.0 }
 0x3c2   : > { %v890_v60 = vadd.f32 %v886_v42, %v796_v43  ;;  %v797_v61 = vmax.f32 %v785_v44, 0.0 }
 0x3c3   : > { %896 = vst [vmem:[%s2610_s15 + $0x10] sm:$0xff] %v892_v57  ;;  %v893_v62 = vadd.f32 %v889_v56, %v799_v58 }
 0x3c4   : > { %894 = vst [vmem:[%s2610_s15] sm:$0xff] %v890_v60  ;;  %v891_v63 = vadd.f32 %v887_v59, %v797_v61 }
 0x3c5   : > { %897 = vst [vmem:[%s2610_s15 + $0x18] sm:$0xff] %v893_v62 }
 0x3c6   : > { %895 = vst [vmem:[%s2610_s15 + $0x8] sm:$0xff] %v891_v63 }
 0x3dc   : > { %v983_v0 = vpop.f32.mrb[12].mxu1 }
 0x3dd   : > { %v1769_v2 = vpop.f32.mrb[13].mxu1 }
 0x3de   : > { %v986_v3 = vpop.f32.mrb[14].mxu1 }
 0x3df   : > { %v990_v4 = vpack.c.bf16 %v986_v3, %v983_v0  ;;  %v1770_v5 = vpop.f32.mrb[15].mxu1 }
 0x3e1   : > { %1775 = vmatprep.subr.bf16.mxu0 %v990_v4 }
 0x3e2   : > { %1776 = vmatpush3.bf16.msra.mxu0 %v990_v4 }
 0x3e3   : > { %1801 = vmatprep.subr.msk.bf16.mxu0 %vm2808_vm0, %v1964_v19 }
 0x3e5   : > { %1778 = vmatmul.mubr.msk.bf16.vlgmr.msra.gmra.mrb[20].mxu0 %vm2819_vm11, %v2352_v15 }
 0x3e6   : > { %1802 = vmatpush3.bf16.msk.msra.mxu0 %vm2808_vm0, %v1964_v19 }
 0x3e7   : > { %1803 = vmatprep.subr.msk.bf16.mxu0 %vm2809_vm14, %v1964_v19 }
 0x3ea   : > { %1804 = vmatpush3.bf16.msk.msra.mxu0 %vm2809_vm14, %v1964_v19 }
 0x3eb   : > { %1805 = vmatprep.subr.msk.bf16.mxu0 %vm2810_vm15, %v1964_v19 }
 0x3ee   : > { %1806 = vmatpush3.bf16.msk.msra.mxu0 %vm2810_vm15, %v1964_v19 }
 0x3ef   : > { %1807 = vmatprep.subr.msk.bf16.mxu0 %vm2811_vm6, %v1964_v19 }
 0x3f2   : > { %1808 = vmatpush3.bf16.msk.msra.mxu0 %vm2811_vm6, %v1964_v19 }
 0x3f3   : > { %1809 = vmatprep.subr.msk.bf16.mxu0 %vm2812_vm9, %v1964_v19 }
 0x3f6   : > { %1810 = vmatpush3.bf16.msk.msra.mxu0 %vm2812_vm9, %v1964_v19 }
 0x3f7   : > { %1811 = vmatprep.subr.msk.bf16.mxu0 %vm2813_vm7, %v1964_v19 }
 0x3fa   : > { %1812 = vmatpush3.bf16.msk.msra.mxu0 %vm2813_vm7, %v1964_v19 }
 0x3fb   : > { %1813 = vmatprep.subr.msk.bf16.mxu0 %vm2816_vm2, %v1964_v19 }
 0x3fe   : > { %1814 = vmatpush3.bf16.msk.msra.mxu0 %vm2816_vm2, %v1964_v19 }
 0x3ff   : > { %1815 = vmatprep.subr.msk.bf16.mxu0 %vm2817_vm10, %v1964_v19 }
 0x402   : > { %1816 = vmatpush3.bf16.msk.msra.mxu0 %vm2817_vm10, %v1964_v19 }
 0x403   : > { %1837 = vmatprep.subr.bf16.mxu0 %v2474_v55 }
 0x4b8   : > { %v1779_v16 = vpop.f32.mrb[20].mxu0 }
 0x4b9   : > { %v1034_v22 = vadd.f32 %v1779_v16, %v2405_v17  ;;  %v1025_v27 = vpop.f32.mrb[21].mxu0 }
 0x4ba   : > { %v1026_v33 = vadd.f32 %v1025_v27, %v2407_v20  ;;  %v1780_v39 = vpop.f32.mrb[22].mxu0 }
 0x4bb   : > { %v1037_v45 = vadd.f32 %v1780_v39, %v2410_v26  ;;  %v1028_v49 = vpop.f32.mrb[23].mxu0  ;;  %v1042_v6 = vmax.f32 %v1034_v22, 0.0 }
 0x4bc   : > { %v1029_v15 = vadd.f32 %v1028_v49, %v2413_v31  ;;  %v1040_v7 = vmax.f32 %v1026_v33, 0.0 }
 0x4bd   : > { %v1043_v54 = vmax.f32 %v1037_v45, 0.0 }
 0x4be   : > { %v1041_v1 = vmax.f32 %v1029_v15, 0.0 }
 0x4bf   : > { %v1045_v51 = vpack.c.bf16 %v1043_v54, %v1042_v6 }
 0x4c0   : > { %v1044_v19 = vpack.c.bf16 %v1041_v1, %v1040_v7 }
 0x4c2   : > { %1797 = vmatprep.mubr.bf16.mxu1 %v1044_v19  ;;  %1817 = vmatprep.mubr.bf16.mxu0 %v1044_v19 }
 0x4c3   : > { %1798 = vmatmul.mubr.bf16.vlgmr.msra.gmra.mrb[16].mxu1 %v1045_v51  ;;  %1818 = vmatmul.mubr.bf16.vlgmr.msra.gmra.mrb[24].mxu0 %v1045_v51 }
 0x4c4   : > { %1838 = vmatpush3.bf16.msra.mxu0 %v2474_v55  ;;  %1839 = vmatprep.mubr.msk.bf16.mxu0 %vm2820_vm3, %v2420_v47 }
 0x4c5   : > { %1833 = vmatprep.mubr.msk.bf16.mxu1 %vm740_vm1, %v2469_v53 }
 0x4cb   : > { %1840 = vmatmul.mubr.msk.bf16.vlgmr.msra.gmra.mrb[28].mxu0 %vm2821_vm12, %v2429_v48 }
 0x596   : > { %v1799_v17 = vpop.f32.mrb[16].mxu1  ;;  %v1819_v20 = vpop.f32.mrb[24].mxu0 }
 0x597   : > { %v1080_v26 = vpop.f32.mrb[17].mxu1  ;;  %v1131_v31 = vpop.f32.mrb[25].mxu0 }
 0x598   : > { %v1800_v18 = vpop.f32.mrb[18].mxu1  ;;  %v1820_v21 = vpop.f32.mrb[26].mxu0 }
 0x599   : > { %v1096_v28 = vpack.c.bf16 %v1800_v18, %v1799_v17  ;;  %v1147_v34 = vpack.c.bf16 %v1820_v21, %v1819_v20  ;;  %v1083_v12 = vpop.f32.mrb[19].mxu1  ;;  %v1134_v14 = vpop.f32.mrb[27].mxu0 }
 0x59a   : > { %v1095_v55 = vpack.c.bf16 %v1083_v12, %v1080_v26  ;;  %v1146_v23 = vpack.c.bf16 %v1134_v14, %v1131_v31 }
 0x59c   : > { %1821 = vmatprep.subr.bf16.mxu1 %v1095_v55 }
 0x59d   : > { %1822 = vmatpush3.bf16.msra.mxu1 %v1095_v55 }
 0x59e   : > { %1823 = vmatprep.subr.bf16.mxu1 %v1096_v28  ;;  %v1841_v47 = vpop.f32.mrb[28].mxu0 }
 0x59f   : > { %v1235_v53 = vpop.f32.mrb[29].mxu0  ;;  %v1244_v25 = vadd.f32 %v1841_v47, %v2591_v11 }
 0x5a0   : > { %v1842_v24 = vpop.f32.mrb[30].mxu0  ;;  %v1236_v29 = vadd.f32 %v1235_v53, %v2587_v9 }
 0x5a1   : > { %1824 = vmatpush3.bf16.msra.mxu1 %v1096_v28  ;;  %v1238_v48 = vpop.f32.mrb[31].mxu0  ;;  %v1247_v32 = vadd.f32 %v1842_v24, %v2596_v13  ;;  %v1252_v42 = vmax.f32 %v1244_v25, 0.0 }
 0x5a2   : > { %1825 = vmatprep.subr.bf16.mxu1 %v1044_v19  ;;  %v1239_v37 = vadd.f32 %v1238_v48, %v2589_v10  ;;  %v1250_v9 = vmax.f32 %v1236_v29, 0.0 }
 0x5a4   : > { %v1251_v56 = vmax.f32 %v1239_v37, 0.0 }
 0x5a5   : > { %1826 = vmatpush3.bf16.msra.mxu1 %v1044_v19 }
 0x5a6   : > { %1827 = vmatprep.subr.bf16.mxu1 %v1045_v51 }
 0x5a9   : > { %1828 = vmatpush3.bf16.msra.mxu1 %v1045_v51 }
 0x5aa   : > { %1829 = vmatprep.subr.bf16.mxu1 %v1146_v23 }
 0x5ad   : > { %1830 = vmatpush3.bf16.msra.mxu1 %v1146_v23 }
 0x5ae   : > { %1831 = vmatprep.subr.bf16.mxu1 %v1147_v34 }
 0x5b1   : > { %1832 = vmatpush3.bf16.msra.mxu1 %v1147_v34 }
 0x5b4   : > { %1834 = vmatmul.mubr.msk.bf16.vlgmr.msra.gmra.mrb[20].mxu1 %vm740_vm1, %v2490_v8 }
 0x687   : > { %v1835_v30 = vpop.f32.mrb[20].mxu1 }
 0x688   : > { %v1191_v35 = vadd.f32 %v1835_v30, %v2583_v50  ;;  %v1182_v36 = vpop.f32.mrb[21].mxu1  ;;  %v1253_v50 = vmax.f32 %v1247_v32, 0.0 }
 0x689   : > { %v1183_v38 = vadd.f32 %v1182_v36, %v2579_v40  ;;  %v1836_v41 = vpop.f32.mrb[22].mxu1 }
 0x68a   : > { %v1199_v8 = vmax.f32 %v1191_v35, 0.0  ;;  %v1194_v11 = vadd.f32 %v1836_v41, %v2585_v52  ;;  %v1185_v43 = vpop.f32.mrb[23].mxu1 }
 0x68b   : > { %v1197_v44 = vmax.f32 %v1183_v38, 0.0  ;;  %v1186_v13 = vadd.f32 %v1185_v43, %v2581_v46 }
 0x68c   : > { %v1256_v10 = vadd.f32 %v1252_v42, %v1199_v8  ;;  %v1200_v40 = vmax.f32 %v1194_v11, 0.0 }
 0x68d   : > { %v1254_v57 = vadd.f32 %v1250_v9, %v1197_v44  ;;  %v1198_v58 = vmax.f32 %v1186_v13, 0.0 }
 0x68e   : > { %1500 = vst [vmem:[%s2610_s15 + $0x30] sm:$0xff] %v1256_v10  ;;  %v1257_v52 = vadd.f32 %v1253_v50, %v1200_v40 }
 0x68f   : > { %1498 = vst [vmem:[%s2610_s15 + $0x20] sm:$0xff] %v1254_v57  ;;  %v1255_v46 = vadd.f32 %v1251_v56, %v1198_v58 }
 0x690   : > { %1501 = vst [vmem:[%s2610_s15 + $0x38] sm:$0xff] %v1257_v52 }
 0x691   : > { %1499 = vst [vmem:[%s2610_s15 + $0x28] sm:$0xff] %v1255_v46 }
 0x692   : > { %1911 = shalt.err (!%p1908_p3)
}
 0x693   : > { %s1912_s17 = scalar_lea.hbm %s2694_s21, 1024  ;;  %s1916_s14 = scalar_lea.hbm %s2751_s7, 2048 }
 0x694   : > { %p1913_p4 = scmp.ne.s32.totalorder %s2694_s21, %s1912_s17  ;;  %p1917_p9 = scmp.lt.u32.totalorder %s2694_s21, %s2751_s7 }
 0x695   : > { %p1918_p10 = scmp.lt.u32.totalorder %s1916_s14, %s1912_s17  ;;  %p1920_p12 = scmp.lt.u32.totalorder %s1912_s17, %s2694_s21 }
 0x696   : > { %p1914_p7 = pnand %p1913_p4, %p2047_p5 }
 0x697   : > { %p1919_p11 = por %p1918_p10, %p1917_p9 }
 0x698   : > { %p1915_p8 = pneg %p1914_p7 }
 0x699   : > { %p1921_p13 = por %p1920_p12, %p1919_p11 }
 0x69b   : > { %p1922_p0 = pnand %p1921_p13, %p1915_p8 }
 0x69d   : > { %1925 = shalt.err (!%p1922_p0)
}
 0x69e   : > { %s1967_s19 = smov 128   ;;  %s1968_s20 = smov 8  }
 0x69f   : > { %1843 = dma.vmem_to_hbm [thread:$0]  (%p2047_p5), %s2696_s18, 1024, %s2694_s21, %s2703_s28, %s1967_s19, %s1967_s19, %s1968_s20  }
 0x6a0 PF: > { %p1849_p1 = scmp.ge.s32.totalorder %s1960_s27, 2  ;;  %s1293_s22 = sand.u32 1, %s1948_s24  }
 0x6a1   : > { %s1294_s23 = scalar_lea.sflag [#allocation3], %s1293_s22 }
 0x6a2   : > { %p1846_p2 = pnand %p1849_p1, %p2051_p6 }
 0x6a4   : > { %1943 = dma.done.wait (!%p1846_p2), %s1294_s23, 1024  }
 0x6a5   : > { %1945 = vsyncadd (!%p1846_p2), %s1294_s23, 4294966272  ;;  %p17_p3 = scmp.ge.s32.totalorder %s2034_s30, 4   ;;  %s2822_s24 = smov %s1952_s25 }
 0x6a6   : > { %s2823_s25 = smov %s1956_s26  ;;  %s2824_s26 = smov %s2045_s10 }
 0x6a7   : > { %s2825_s27 = smov %s2034_s30  ;;  %19 = sbr.rel (!%p17_p3) target bundleno = 3 (0x3), region = 85 }
 0x6ae   :  { %1299 = vsyncpa [#allocation3], 1 }
 0x6af   :  { %1301 = vsyncpa [#allocation3 + $0x1], 1 }

</bundles_post_ra>
